<compile_context>
chip_gen: v6e
topology: v6e:2x2x1
jax: 0.10.0
libtpu: 0.0.40
codegen_flags: <defaults>
</compile_context>

<pallas_src>
import jax
import jax.numpy as jnp
from jax.experimental import pallas as pl
from jax.experimental.pallas import tpu as pltpu

REC = 3  # number of recursive fc applications (module default)


def rse_kernel(x_ref, w1t_ref, b1_ref, w2_ref, b2_ref, o_ref):
    # x_ref  : (1, C, HW)  VMEM  one batch element, spatial flattened onto lanes
    # w1t_ref: (C, MID)    VMEM  fc[0].weight, pre-transposed (w1t[c, j] = W1[j, c])
    # b1_ref : (1, MID)    VMEM  fc[0].bias
    # w2_ref : (C, MID)    VMEM  fc[2].weight in natural PyTorch layout
    # b2_ref : (C, 1)      VMEM  fc[2].bias
    # o_ref  : (1, C, HW)  VMEM  output tile
    x = x_ref[0].astype(jnp.float32)                    # (C, HW)
    w1t = w1t_ref[...].astype(jnp.float32)              # (C, MID)
    b1 = b1_ref[...].astype(jnp.float32)                # (1, MID)
    w2 = w2_ref[...].astype(jnp.float32)                # (C, MID)
    b2 = b2_ref[...].astype(jnp.float32)                # (C, 1)

    # --- Squeeze: global average pool over the lane-dense spatial axis ---
    inv_hw = jnp.float32(1.0 / x.shape[-1])
    y = jnp.sum(x, axis=-1, keepdims=True) * inv_hw     # (C, 1)

    # --- Recursive excitation: rec x (Linear -> ReLU -> Linear), unrolled ---
    # Kept off the MXU: broadcast-multiply + cross-lane/sublane reductions.
    for _ in range(REC):
        # h_j = relu(sum_c y_c * W1[j, c] + b1_j)
        h = jnp.maximum(jnp.sum(y * w1t, axis=0, keepdims=True) + b1, 0.0)   # (1, MID)
        # y_c = sum_j h_j * W2[c, j] + b2_c
        y = jnp.sum(h * w2, axis=1, keepdims=True) + b2                      # (C, 1)

    # --- Gate: broadcast per-channel scale over the spatial axis ---
    # The reference forward never applies self.sigmoid, so neither do we.
    o_ref[0] = (x * y).astype(o_ref.dtype)


def recursive_se(x, w1, b1, w2, b2):
    """x: (B, C, H, W); w1: (MID, C); b1: (MID,); w2: (C, MID); b2: (C,)."""
    B, C, H, W = x.shape
    HW = H * W
    mid = w1.shape[0]

    x2 = x.reshape(B, C, HW)                    # lane-dense layout (HW = 256 >= 128)
    w1t = w1.T                                  # (C, MID): no transpose inside kernel
    b1_2d = b1.reshape(1, mid)
    b2_2d = b2.reshape(C, 1)

    out = pl.pallas_call(
        rse_kernel,
        out_shape=jax.ShapeDtypeStruct((B, C, HW), x.dtype),
        grid_spec=pltpu.PrefetchScalarGridSpec(
            num_scalar_prefetch=0,
            grid=(B,),
            in_specs=[
                pl.BlockSpec((1, C, HW), lambda i: (i, 0, 0)),
                pl.BlockSpec((C, mid), lambda i: (0, 0)),      # resident across steps
                pl.BlockSpec((1, mid), lambda i: (0, 0)),
                pl.BlockSpec((C, mid), lambda i: (0, 0)),
                pl.BlockSpec((C, 1), lambda i: (0, 0)),
            ],
            out_specs=pl.BlockSpec((1, C, HW), lambda i: (i, 0, 0)),
        ),
        compiler_params=pltpu.CompilerParams(
            dimension_semantics=("parallel",),        # lets v7x spread batch over 2 TCs
            vmem_limit_bytes=32 * 1024 * 1024,        # safe on v5e/v6e/v7x
        ),
    )(x2, w1t, b1_2d, w2, b2_2d)
    return out.reshape(B, C, H, W)


def recursive_se_ref(x, w1, b1, w2, b2, rec=REC):
    """Pure-JAX reference mirroring the PyTorch forward."""
    y = jnp.mean(x, axis=(2, 3))                         # (B, C)
    for _ in range(rec):
        h = jax.nn.relu(y @ w1.T + b1)
        y = h @ w2.T + b2
    return x * y[:, :, None, None]


if __name__ == "__main__":
    key = jax.random.PRNGKey(0)
    kx, k1, k2, k3, k4 = jax.random.split(key, 5)

    B, C, H, W = 2, 64, 16, 16
    REDUCTION = 16
    MID = C // REDUCTION                                  # = 4

    x = jax.random.normal(kx, (B, C, H, W), dtype=jnp.float32)

    # Deterministic synthetic Linear parameters (shapes from nn.Linear).
    bound1 = 1.0 / (C ** 0.5)
    w1 = jax.random.uniform(k1, (MID, C), jnp.float32, -bound1, bound1)
    b1 = jax.random.uniform(k2, (MID,), jnp.float32, -bound1, bound1)
    bound2 = 1.0 / (MID ** 0.5)
    w2 = jax.random.uniform(k3, (C, MID), jnp.float32, -bound2, bound2)
    b2 = jax.random.uniform(k4, (C,), jnp.float32, -bound2, bound2)

    out = recursive_se(x, w1, b1, w2, b2)
    out = jax.block_until_ready(out)

    ref = recursive_se_ref(x, w1, b1, w2, b2)
    assert out.shape == (B, C, H, W)
    assert jnp.allclose(out, ref, atol=1e-5, rtol=1e-5), "mismatch vs reference"

    print("KERNEL_OK")
</pallas_src>

<mosaic_0001>
module attributes {stable_mosaic.version = 11 : i64} {
  func.func @rse_kernel(%arg0: i32, %arg1: memref<1x64x256xf32, #tpu.memory_space<vmem>>, %arg2: memref<64x4xf32, #tpu.memory_space<vmem>>, %arg3: memref<1x4xf32, #tpu.memory_space<vmem>>, %arg4: memref<64x4xf32, #tpu.memory_space<vmem>>, %arg5: memref<64x1xf32, #tpu.memory_space<vmem>>, %arg6: memref<1x64x256xf32, #tpu.memory_space<vmem>>) attributes {dimension_semantics = [#tpu.dimension_semantics<parallel>], iteration_bounds = array<i64: 2>, scalar_prefetch = 0 : i64, scratch_operands = 0 : i64, tpu.core_type = #tpu.core_type<tc>, window_params = [{transform_indices = @transform_0, window_bounds = array<i64: 1, 64, 256>}, {pipeline_mode = #tpu.pipeline_mode<synchronous>, transform_indices = @transform_1, window_bounds = array<i64: 64, 4>}, {pipeline_mode = #tpu.pipeline_mode<synchronous>, transform_indices = @transform_2, window_bounds = array<i64: 1, 4>}, {pipeline_mode = #tpu.pipeline_mode<synchronous>, transform_indices = @transform_3, window_bounds = array<i64: 64, 4>}, {pipeline_mode = #tpu.pipeline_mode<synchronous>, transform_indices = @transform_4, window_bounds = array<i64: 64, 1>}, {transform_indices = @transform_5, window_bounds = array<i64: 1, 64, 256>}]} {
    %c0 = arith.constant 0 : index
    %c0_0 = arith.constant 0 : index
    %c0_1 = arith.constant 0 : index
    %0 = vector.load %arg1[%c0, %c0_0, %c0_1] : memref<1x64x256xf32, #tpu.memory_space<vmem>>, vector<1x64x256xf32>
    %1 = vector.shape_cast %0 : vector<1x64x256xf32> to vector<64x256xf32>
    %c0_2 = arith.constant 0 : index
    %c0_3 = arith.constant 0 : index
    %2 = vector.load %arg2[%c0_2, %c0_3] : memref<64x4xf32, #tpu.memory_space<vmem>>, vector<64x4xf32>
    %c0_4 = arith.constant 0 : index
    %c0_5 = arith.constant 0 : index
    %3 = vector.load %arg3[%c0_4, %c0_5] : memref<1x4xf32, #tpu.memory_space<vmem>>, vector<1x4xf32>
    %c0_6 = arith.constant 0 : index
    %c0_7 = arith.constant 0 : index
    %4 = vector.load %arg4[%c0_6, %c0_7] : memref<64x4xf32, #tpu.memory_space<vmem>>, vector<64x4xf32>
    %c0_8 = arith.constant 0 : index
    %c0_9 = arith.constant 0 : index
    %5 = vector.load %arg5[%c0_8, %c0_9] : memref<64x1xf32, #tpu.memory_space<vmem>>, vector<64x1xf32>
    %cst = arith.constant dense<0.000000e+00> : vector<64xf32>
    %6 = vector.multi_reduction <add>, %1, %cst [1] : vector<64x256xf32> to vector<64xf32>
    %7 = vector.shape_cast %6 : vector<64xf32> to vector<64x1xf32>
    %cst_10 = arith.constant 3.906250e-03 : f32
    %8 = vector.broadcast %cst_10 : f32 to vector<64x1xf32>
    %9 = arith.mulf %7, %8 : vector<64x1xf32>
    %10 = vector.broadcast %9 : vector<64x1xf32> to vector<64x4xf32>
    %11 = arith.mulf %10, %2 : vector<64x4xf32>
    %cst_11 = arith.constant dense<0.000000e+00> : vector<4xf32>
    %12 = vector.multi_reduction <add>, %11, %cst_11 [0] : vector<64x4xf32> to vector<4xf32>
    %13 = vector.shape_cast %12 : vector<4xf32> to vector<1x4xf32>
    %14 = arith.addf %13, %3 : vector<1x4xf32>
    %cst_12 = arith.constant 0.000000e+00 : f32
    %15 = vector.broadcast %cst_12 : f32 to vector<1x4xf32>
    %16 = arith.maximumf %14, %15 : vector<1x4xf32>
    %17 = vector.broadcast %16 : vector<1x4xf32> to vector<64x4xf32>
    %18 = arith.mulf %17, %4 : vector<64x4xf32>
    %cst_13 = arith.constant dense<0.000000e+00> : vector<64xf32>
    %19 = vector.multi_reduction <add>, %18, %cst_13 [1] : vector<64x4xf32> to vector<64xf32>
    %20 = vector.shape_cast %19 : vector<64xf32> to vector<64x1xf32>
    %21 = arith.addf %20, %5 : vector<64x1xf32>
    %22 = vector.broadcast %21 : vector<64x1xf32> to vector<64x4xf32>
    %23 = arith.mulf %22, %2 : vector<64x4xf32>
    %cst_14 = arith.constant dense<0.000000e+00> : vector<4xf32>
    %24 = vector.multi_reduction <add>, %23, %cst_14 [0] : vector<64x4xf32> to vector<4xf32>
    %25 = vector.shape_cast %24 : vector<4xf32> to vector<1x4xf32>
    %26 = arith.addf %25, %3 : vector<1x4xf32>
    %cst_15 = arith.constant 0.000000e+00 : f32
    %27 = vector.broadcast %cst_15 : f32 to vector<1x4xf32>
    %28 = arith.maximumf %26, %27 : vector<1x4xf32>
    %29 = vector.broadcast %28 : vector<1x4xf32> to vector<64x4xf32>
    %30 = arith.mulf %29, %4 : vector<64x4xf32>
    %cst_16 = arith.constant dense<0.000000e+00> : vector<64xf32>
    %31 = vector.multi_reduction <add>, %30, %cst_16 [1] : vector<64x4xf32> to vector<64xf32>
    %32 = vector.shape_cast %31 : vector<64xf32> to vector<64x1xf32>
    %33 = arith.addf %32, %5 : vector<64x1xf32>
    %34 = vector.broadcast %33 : vector<64x1xf32> to vector<64x4xf32>
    %35 = arith.mulf %34, %2 : vector<64x4xf32>
    %cst_17 = arith.constant dense<0.000000e+00> : vector<4xf32>
    %36 = vector.multi_reduction <add>, %35, %cst_17 [0] : vector<64x4xf32> to vector<4xf32>
    %37 = vector.shape_cast %36 : vector<4xf32> to vector<1x4xf32>
    %38 = arith.addf %37, %3 : vector<1x4xf32>
    %cst_18 = arith.constant 0.000000e+00 : f32
    %39 = vector.broadcast %cst_18 : f32 to vector<1x4xf32>
    %40 = arith.maximumf %38, %39 : vector<1x4xf32>
    %41 = vector.broadcast %40 : vector<1x4xf32> to vector<64x4xf32>
    %42 = arith.mulf %41, %4 : vector<64x4xf32>
    %cst_19 = arith.constant dense<0.000000e+00> : vector<64xf32>
    %43 = vector.multi_reduction <add>, %42, %cst_19 [1] : vector<64x4xf32> to vector<64xf32>
    %44 = vector.shape_cast %43 : vector<64xf32> to vector<64x1xf32>
    %45 = arith.addf %44, %5 : vector<64x1xf32>
    %46 = vector.broadcast %45 : vector<64x1xf32> to vector<64x256xf32>
    %47 = arith.mulf %1, %46 : vector<64x256xf32>
    %c0_20 = arith.constant 0 : index
    %c0_21 = arith.constant 0 : index
    %c0_22 = arith.constant 0 : index
    %48 = vector.load %arg6[%c0_20, %c0_21, %c0_22] : memref<1x64x256xf32, #tpu.memory_space<vmem>>, vector<1x64x256xf32>
    %49 = vector.shape_cast %48 : vector<1x64x256xf32> to vector<64x256xf32>
    %50 = vector.shape_cast %47 : vector<64x256xf32> to vector<1x64x256xf32>
    tpu.vector_store %arg6[%c0_20, %c0_21, %c0_22], %50 {strides = array<i32>} : memref<1x64x256xf32, #tpu.memory_space<vmem>>, vector<1x64x256xf32>,
    return
  }
  func.func @transform_0(%arg0: i32) -> (i32, i32, i32) {
    %c0_i32 = arith.constant 0 : i32
    %c0_i32_0 = arith.constant 0 : i32
    %c0_i32_1 = arith.constant 0 : i32
    return %arg0, %c0_i32, %c0_i32_0 : i32, i32, i32
  }
  func.func @transform_1(%arg0: i32) -> (i32, i32) {
    %c0_i32 = arith.constant 0 : i32
    %c0_i32_0 = arith.constant 0 : i32
    %c0_i32_1 = arith.constant 0 : i32
    return %c0_i32, %c0_i32_0 : i32, i32
  }
  func.func @transform_2(%arg0: i32) -> (i32, i32) {
    %c0_i32 = arith.constant 0 : i32
    %c0_i32_0 = arith.constant 0 : i32
    %c0_i32_1 = arith.constant 0 : i32
    return %c0_i32, %c0_i32_0 : i32, i32
  }
  func.func @transform_3(%arg0: i32) -> (i32, i32) {
    %c0_i32 = arith.constant 0 : i32
    %c0_i32_0 = arith.constant 0 : i32
    %c0_i32_1 = arith.constant 0 : i32
    return %c0_i32, %c0_i32_0 : i32, i32
  }
  func.func @transform_4(%arg0: i32) -> (i32, i32) {
    %c0_i32 = arith.constant 0 : i32
    %c0_i32_0 = arith.constant 0 : i32
    %c0_i32_1 = arith.constant 0 : i32
    return %c0_i32, %c0_i32_0 : i32, i32
  }
  func.func @transform_5(%arg0: i32) -> (i32, i32, i32) {
    %c0_i32 = arith.constant 0 : i32
    %c0_i32_0 = arith.constant 0 : i32
    %c0_i32_1 = arith.constant 0 : i32
    return %arg0, %c0_i32, %c0_i32_0 : i32, i32, i32
  }
}

</mosaic_0001>

<bundles_post_ra>
// kernel: tpu_custom_call.1
= control target key start
LH: loop header
LB: loop body
LE: loop exit
PB: predicated region body
PF: predicated region fallthrough
CT: control target
= control target key end

     0   :  { %10 = vsyncpa [#allocation3], 0  ;;  %s1475_s0 = inlined_call_operand.hbm [shape: f32[2,64,256], index: 0, kind: input, shape index: {}]   ;;  %s1476_s1 = inlined_call_operand.vmem [shape: f32[64,4], index: 1, kind: input, shape index: {}]   ;;  %s1477_s2 = inlined_call_operand.vmem [shape: f32[1,4], index: 2, kind: input, shape index: {}]   ;;  %s1478_s3 = inlined_call_operand.vmem [shape: f32[64,4], index: 3, kind: input, shape index: {}]   ;;  %s1479_s4 = inlined_call_operand.vmem [shape: f32[64,1], index: 4, kind: input, shape index: {}]   ;;  %s1480_s5 = inlined_call_operand.hbm [shape: f32[2,64,256], index: 5, kind: output, shape index: {}]  }
   0x1   :  { %12 = vsyncpa [#allocation3 + $0x1], 0 }
   0x2   :  { %13 = vsyncpa [#allocation4], 0 }
   0x3   :  { %15 = vsyncpa [#allocation4 + $0x1], 0  ;;  %s981_s18 = smov 0   ;;  %s983_s19 = smov 0  }
   0x4   :  { %s985_s20 = smov 0   ;;  %s987_s21 = smov 0  }
   0x5 LB: > { %s1002_s22 = sadd.s32 4294967295, %s942_s21   ;;  %s781_s23 = sadd.s32 4294967294, %s942_s21   ;;  %s942_s21 = sphi %s987_s21, %s1495_s21   ;;  %s938_s20 = sphi %s985_s20, %s1494_s20   ;;  %s934_s19 = sphi %s983_s19, %s1493_s19   ;;  %s930_s18 = sphi %s981_s18, %s1492_s18  }
   0x6   : > { %s1006_s24 = sadd.s32 1, %s942_s21   ;;  %s28_s25 = sadd.s32 1, %s938_s20 }
   0x7   : > { %s25_s26 = ssub.s32 %s942_s21, %s1006_s24  ;;  %p35_p0 = scmp.ne.s32.totalorder %s938_s20, %s934_s19 }
   0x8   : > { %p26_p1 = scmp.eq.s32.totalorder %s25_s26, 0  ;;  %p36_p2 = scmp.eq.s32.totalorder %s942_s21, 0 }
   0x9   : > { %p41_p3 = scmp.ne.s32.totalorder %s934_s19, %s930_s18  ;;  %p42_p4 = scmp.eq.s32.totalorder %s1002_s22, 0 }
   0xa   : > { %s1018_s27 = scalar_select %p26_p1, %s938_s20, %s28_s25  }
   0xb   : > { %p1020_p5 = por %p36_p2, %p35_p0  ;;  %p1024_p6 = por %p42_p4, %p41_p3 }
   0xc   : > { %p149_p7 = scmp.eq.s32.totalorder %s1002_s22, 1  ;;  %p155_p8 = scmp.eq.s32.totalorder %s781_s23, 1 }
   0xd   : > { %s1484_s29 = scalar_select %p1024_p6, 1, 0 }
   0xe   : > { %p809_p10 = scmp.lt.s32.totalorder %s942_s21, 2  ;;  %p1031_p11 = por %p149_p7, %p35_p0 }
   0xf   : > { %p1035_p12 = por %p155_p8, %p41_p3  ;;  %s187_s7 = sand.u32 1, %s938_s20  }
  0x10   : > { %s1485_s30 = scalar_select %p1031_p11, 1, 0 }
  0x11   : > { %s1486_s6 = scalar_select %p1035_p12, 1, 0 }
  0x12   : > { %s795_s8 = sshll.u32 %s942_s21, 11  ;;  %s784_s9 = sshll.u32 %s187_s7, 7 }
  0x13   : > { %s1044_s12 = scalar_lea.hbm %s1475_s0, %s795_s8  ;;  %s191_s13 = scalar_lea.vmem [#allocation2], %s784_s9 }
  0x14   : > { %s198_s14 = sshll.u32 %s191_s13, 4  ;;  %p1048_p13 = pnand %p809_p10, %p1020_p5  ;;  %s1052_s14 = int_to_ptr.vmem [resolvable:$true] %s198_s14 }
  0x15   : > { %s1054_s16 = scalar_lea.sflag [#allocation3], %s187_s7  ;;  %s850_s17 = scalar_lea.hbm %s1044_s12, 2048 }
  0x16   : > { %p851_p0 = scmp.ne.s32.totalorder %s1044_s12, %s850_s17  ;;  %p852_p1 = pneg %p1048_p13 }
  0x17   : > { %s855_s26 = scalar_lea.hbm %s1475_s0, 4096  ;;  %p856_p4 = scmp.lt.s32.totalorder %s1044_s12, %s1475_s0 }
  0x18   : > { %p853_p2 = pnand %p852_p1, %p851_p0  ;;  %p857_p5 = scmp.lt.s32.totalorder %s855_s26, %s850_s17 }
  0x1a   : > { %p854_p3 = pneg %p853_p2  ;;  %p858_p7 = por %p857_p5, %p856_p4 }
  0x1c   : > { %p859_p8 = pnand %p858_p7, %p854_p3 }
  0x1e   : > { %862 = shalt.err (!%p859_p8)
}
  0x1f   : > { %s863_s7 = scalar_lea.vmem %s1052_s14, 2048  ;;  %s944_s9 = smov [#allocation2]  }
  0x20   : > { %p864_p10 = scmp.ne.s32.totalorder %s1052_s14, %s863_s7  ;;  %s868_s10 = sshll.u32 %s944_s9, 4  ;;  %s869_s10 = int_to_ptr.vmem [resolvable:$false] %s868_s10 }
  0x21   : > { %s870_s11 = scalar_lea.vmem %s869_s10, 4096  ;;  %p871_p2 = scmp.lt.s32.totalorder %s1052_s14, %s869_s10 }
  0x22   : > { %p866_p9 = pnand %p864_p10, %p852_p1  ;;  %p872_p12 = scmp.lt.s32.totalorder %s870_s11, %s863_s7 }
  0x24   : > { %p867_p0 = pneg %p866_p9  ;;  %p873_p11 = por %p872_p12, %p871_p2 }
  0x26   : > { %p874_p6 = pnand %p873_p11, %p867_p0 }
  0x28   : > { %877 = shalt.err (!%p874_p6)
}
  0x29   : > { %s945_s13 = smov 256   ;;  %s946_s17 = smov 16  }
  0x2a   : > { %804 = dma.hbm_to_vmem [thread:$0]  (!%p1048_p13), %s1044_s12, 2048, %s1052_s14, %s1054_s16, %s945_s13, %s945_s13, %s946_s17  }
  0x2b   : > { %p787_p9 = scmp.ge.s32.totalorder %s942_s21, 1  ;;  %p206_p1 = scmp.lt.s32.totalorder %s942_s21, 3 }
  0x2d   : > { %p207_p3 = pnand %p787_p9, %p206_p1 }
  0x2e   : > { %s1078_s23 = sand.u32 (!%p207_p3), 1, %s934_s19   ;;  %p1488_p6 = scmp.ne.s32.totalorder (!%p207_p3), %s1484_s29, 0 }
  0x2f   : > { %210 = sbr.rel (%p207_p3) target bundleno = 1149 (0x47d), region = 40  ;;  %s788_s25 = sshll.u32 (!%p207_p3), %s1078_s23, 7 }
  0x30   : > { %s213_s26 = scalar_lea.sflag (!%p207_p3), [#allocation3], %s1078_s23  ;;  %s216_s28 = scalar_lea.vmem (!%p207_p3), [#allocation2], %s788_s25 }
  0x34   : > { %921 = dma.done.wait (%p1488_p6), %s213_s26, 2048  }
  0x35   : > { %923 = vsyncadd (%p1488_p6), %s213_s26, 4294965248  ;;  %v1088_v0 = vld [vmem:[%s216_s28] sm:$0xff]  ;;  %v1090_v1 = vld [vmem:[%s216_s28 + $0x8] sm:$0xff]  ;;  %vm324_vm0 = vcmask 31744   ;;  %s1395_s10 = scalar_lea.vmem [#allocation5], %s788_s25  ;;  %s796_s25 = sshll.u32 %s1002_s22, 11 }
  0x36   : > { %v1092_v2 = vld [vmem:[%s216_s28 + $0x20] sm:$0xff]  ;;  %v284_v3 = vadd.f32 %v1090_v1, %v1088_v0  ;;  %v1096_v4 = vld [vmem:[%s216_s28 + $0x28] sm:$0xff]  ;;  %v1098_v5 = vld [vmem:[%s216_s28 + $0x10] sm:$0xff]  ;;  %s708_s11 = sshll.u32 %s1395_s10, 4  ;;  %s1422_s26 = scalar_lea.hbm %s1480_s5, %s796_s25  ;;  %s1424_s11 = int_to_ptr.vmem [resolvable:$true] %s708_s11 }
  0x37   : > { %v1100_v6 = vld [vmem:[%s216_s28 + $0x18] sm:$0xff]  ;;  %v290_v7 = vadd.f32 %v1096_v4, %v1092_v2  ;;  %v1104_v8 = vld [vmem:[%s216_s28 + $0x30] sm:$0xff]  ;;  %v1112_v12 = vld [vmem:[%s216_s28 + $0x40] sm:$0xff]  ;;  %s695_s22 = scalar_lea.sflag [#allocation4], %s1078_s23  ;;  %p1489_p12 = scmp.ne.s32.totalorder %s1485_s30, 0 }
  0x38   : > { %v1106_v9 = vld [vmem:[%s216_s28 + $0x38] sm:$0xff]  ;;  %285 = vadd.xlane.f32.xlu0 %v284_v3  ;;  %v287_v10 = vadd.f32 %v1100_v6, %v1098_v5  ;;  %v1114_v13 = vld [vmem:[%s216_s28 + $0x48] sm:$0xff]  ;;  %v1116_v14 = vld [vmem:[%s216_s28 + $0x50] sm:$0xff]  ;;  %s948_s29 = smov [#allocation5]  }
  0x39   : > { %291 = vadd.xlane.f32.xlu1 %v290_v7  ;;  %v293_v11 = vadd.f32 %v1106_v9, %v1104_v8  ;;  %v1118_v15 = vld [vmem:[%s216_s28 + $0x58] sm:$0xff]  ;;  %v296_v16 = vadd.f32 %v1114_v13, %v1112_v12  ;;  %v1124_v18 = vld [vmem:[%s216_s28 + $0x60] sm:$0xff]  ;;  %v1126_v19 = vld [vmem:[%s216_s28 + $0x68] sm:$0xff]  ;;  %s882_s12 = sshll.u32 %s948_s29, 4  ;;  %s883_s12 = int_to_ptr.vmem [resolvable:$false] %s882_s12 }
  0x3a   : > { %v299_v17 = vadd.f32 %v1118_v15, %v1116_v14  ;;  %v1128_v20 = vld [vmem:[%s216_s28 + $0x70] sm:$0xff]  ;;  %v1130_v21 = vld [vmem:[%s216_s28 + $0x78] sm:$0xff]  ;;  %v302_v22 = vadd.f32 %v1126_v19, %v1124_v18  ;;  %v1139_v27 = vld [vmem:[%s1476_s1] sm:$0xff]  ;;  %s878_s28 = scalar_lea.vmem %s1424_s11, 2048  ;;  %s884_s14 = scalar_lea.vmem %s883_s12, 4096 }
  0x3b   : > { %v305_v23 = vadd.f32 %v1130_v21, %v1128_v20  ;;  %v1144_v29 = vld [vmem:[%s1476_s1 + $0x10] sm:$0xff]  ;;  %v1149_v30 = vld [vmem:[%s1476_s1 + $0x8] sm:$0xff]  ;;  %v1155_v34 = vld [vmem:[%s1476_s1 + $0x18] sm:$0xff]  ;;  %p879_p11 = scmp.ne.s32.totalorder %s1424_s11, %s878_s28  ;;  %p885_p5 = scmp.lt.s32.totalorder %s1424_s11, %s883_s12 }
  0x3c   : > { %288 = vadd.xlane.f32.xlu0 %v287_v10  ;;  %v1163_v40 = vld [vmem:[%s1476_s1 + $0x20] sm:$0xff]  ;;  %v1170_v45 = vld [vmem:[%s1476_s1 + $0x28] sm:$0xff]  ;;  %v1179_v54 = vld [vmem:[%s1476_s1 + $0x30] sm:$0xff]  ;;  %p886_p7 = scmp.lt.s32.totalorder %s884_s14, %s878_s28 }
  0x3d   : > { %294 = vadd.xlane.f32.xlu1 %v293_v11  ;;  %v1185_v58 = vld [vmem:[%s1476_s1 + $0x38] sm:$0xff]  ;;  %p880_p13 = pnand %p879_p11, %p1489_p12 }
  0x3e   : > { %p887_p8 = por %p886_p7, %p885_p5 }
  0x3f   : > { %p881_p4 = pneg %p880_p13 }
  0x40   : > { %297 = vadd.xlane.f32.xlu0 %v296_v16 }
  0x41   : > { %300 = vadd.xlane.f32.xlu1 %v299_v17  ;;  %p888_p10 = pnand %p887_p8, %p881_p4 }
  0x44   : > { %303 = vadd.xlane.f32.xlu0 %v302_v22 }
  0x45   : > { %306 = vadd.xlane.f32.xlu1 %v305_v23 }
  0xc1   : > { %v286_v24 = vpop.xlane.xlu0 %285 }
  0xc2   : > { %v308_v25 = vmul.f32 0.00390625, %v286_v24  ;;  %v292_v26 = vpop.xlane.xlu1 %291 }
  0xc3   : > { %v310_v28 = vmul.f32 0.00390625, %v292_v26 }
  0xc4   : > { %v316_v32 = vmul.f32 %v308_v25, %v1139_v27  ;;  %v348_v25 = vlaneseq }
  0xc5   : > { %v289_v31 = vpop.xlane.xlu0 %288  ;;  %v318_v37 = vmul.f32 %v310_v28, %v1144_v29 }
  0xc6   : > { %v309_v33 = vmul.f32 0.00390625, %v289_v31  ;;  %v295_v35 = vpop.xlane.xlu1 %294  ;;  %v325_v42 = vsel %vm324_vm0, %v316_v32, 0.0  ;;  %v349_v31 = vshrl.u32 %v348_v25, 7 }
  0xc7   : > { %v311_v36 = vmul.f32 0.00390625, %v295_v35  ;;  %v328_v49 = vsel %vm324_vm0, %v318_v37, 0.0 }
  0xc8   : > { %v317_v38 = vmul.f32 %v309_v33, %v1149_v30  ;;  %v1195_v33 = vld [vmem:[%s1477_s2] sm:$0x1] }
  0xc9   : > { %v319_v39 = vmul.f32 %v311_v36, %v1155_v34  ;;  %v298_v41 = vpop.xlane.xlu0 %297  ;;  %v1197_v36 = vsub.s32 0, %v349_v31 }
  0xca   : > { %v326_v43 = vsel %vm324_vm0, %v317_v38, 0.0  ;;  %v312_v44 = vmul.f32 0.00390625, %v298_v41  ;;  %v301_v46 = vpop.xlane.xlu1 %300  ;;  %v1208_v41 = vld [vmem:[%s1478_s3] sm:$0xff] }
  0xcb   : > { %v327_v47 = vadd.f32 %v326_v43, %v325_v42  ;;  %v313_v48 = vmul.f32 0.00390625, %v301_v46  ;;  %v330_v50 = vsel %vm324_vm0, %v319_v39, 0.0  ;;  %v1203_v39 = vld [vmem:[%s1478_s3 + $0x8] sm:$0xff]  ;;  %v1214_v43 = vld [vmem:[%s1478_s3 + $0x18] sm:$0xff] }
  0xcc   : > { %v320_v51 = vmul.f32 %v312_v44, %v1163_v40  ;;  %v1219_v44 = vld [vmem:[%s1478_s3 + $0x10] sm:$0xff] }
  0xcd   : > { %v329_v52 = vadd.f32 %v328_v49, %v327_v47  ;;  %v321_v53 = vmul.f32 %v313_v48, %v1170_v45  ;;  %v304_v55 = vpop.xlane.xlu0 %303 }
  0xce   : > { %v332_v56 = vsel %vm324_vm0, %v320_v51, 0.0  ;;  %v314_v57 = vmul.f32 0.00390625, %v304_v55  ;;  %v307_v59 = vpop.xlane.xlu1 %306 }
  0xcf   : > { %v331_v60 = vadd.f32 %v330_v50, %v329_v52  ;;  %v315_v61 = vmul.f32 0.00390625, %v307_v59  ;;  %v334_v62 = vsel %vm324_vm0, %v321_v53, 0.0  ;;  %v1230_v52 = vld [vmem:[%s1478_s3 + $0x28] sm:$0xff]  ;;  %v1235_v53 = vld [vmem:[%s1478_s3 + $0x20] sm:$0xff] }
  0xd0   : > { %v322_v63 = vmul.f32 %v314_v57, %v1179_v54 }
  0xd1   : > { %v333_v3 = vadd.f32 %v332_v56, %v331_v60  ;;  %v323_v7 = vmul.f32 %v315_v61, %v1185_v58  ;;  %v1244_v60 = vld [vmem:[%s1478_s3 + $0x38] sm:$0xff]  ;;  %v1249_v61 = vld [vmem:[%s1478_s3 + $0x30] sm:$0xff] }
  0xd2   : > { %v336_v10 = vsel %vm324_vm0, %v322_v63, 0.0 }
  0xd3   : > { %v335_v11 = vadd.f32 %v334_v62, %v333_v3  ;;  %v338_v16 = vsel %vm324_vm0, %v323_v7, 0.0 }
  0xd5   : > { %v337_v17 = vadd.f32 %v336_v10, %v335_v11 }
  0xd7   : > { %v339_v22 = vadd.f32 %v338_v16, %v337_v17  ;;  %v947_v16 = vmov 0   ;;  %v1260_v17 = vld [vmem:[%s1479_s4 + $0x8] sm:$0xff] }
  0xd8   : > { %849 = vset.pattern.permute.xlu1 %v947_v16  ;;  %848 = vset.pattern.permute.xlu0 %v947_v16 }
  0xd9   : > { %v340_v23 = vrot.slane %v339_v22, 4 }
  0xdb   : > { %v341_v24 = vadd.f32 %v340_v23, %v339_v22  ;;  %v1265_v22 = vld [vmem:[%s1479_s4] sm:$0xff] }
  0xdd   : > { %v342_v26 = vrot.slane %v341_v24, 2 }
  0xdf   : > { %v343_v28 = vadd.f32 %v342_v26, %v341_v24 }
  0xe1   : > { %v344_v32 = vrot.slane %v343_v28, 1 }
  0xe3   : > { %v345_v35 = vadd.f32 %v344_v32, %v343_v28  ;;  %v1272_v28 = vld [vmem:[%s1479_s4 + $0x10] sm:$0xff] }
  0xe5   : > { %v346_v37 = vadd.f32 %v345_v35, %v1195_v33  ;;  %v1278_v35 = vld [vmem:[%s1479_s4 + $0x18] sm:$0xff] }
  0xe7   : > { %v347_v38 = vmax.f32 %v346_v37, 0.0 }
  0xe9   : > { %v351_v42 = vrot.slane %v347_v38, %v1197_v36 }
  0xeb   : > { %v353_v46 = vmul.f32 %v351_v42, %v1203_v39  ;;  %v352_v47 = vmul.f32 %v351_v42, %v1208_v41  ;;  %v355_v50 = vmul.f32 %v351_v42, %v1214_v43  ;;  %v354_v51 = vmul.f32 %v351_v42, %v1219_v44 }
  0xec   : > { %v357_v57 = vmul.f32 %v351_v42, %v1230_v52  ;;  %v356_v59 = vmul.f32 %v351_v42, %v1235_v53  ;;  %v359_v3 = vmul.f32 %v351_v42, %v1244_v60  ;;  %v358_v7 = vmul.f32 %v351_v42, %v1249_v61  ;;  %v1284_v42 = vld [vmem:[%s1479_s4 + $0x20] sm:$0xff] }
  0xed   : > { %v363_v48 = vsel %vm324_vm0, %v353_v46, 0.0  ;;  %v360_v49 = vsel %vm324_vm0, %v352_v47, 0.0  ;;  %v369_v55 = vsel %vm324_vm0, %v355_v50, 0.0  ;;  %v366_v56 = vsel %vm324_vm0, %v354_v51, 0.0  ;;  %v1296_v51 = vld [vmem:[%s1479_s4 + $0x30] sm:$0xff] }
  0xee   : > { %364 = vadd.xlane.f32.xlu1 %v363_v48  ;;  %361 = vadd.xlane.f32.xlu0 %v360_v49  ;;  %v375_v62 = vsel %vm324_vm0, %v357_v57, 0.0  ;;  %v372_v63 = vsel %vm324_vm0, %v356_v59, 0.0  ;;  %v381_v10 = vsel %vm324_vm0, %v359_v3, 0.0  ;;  %v378_v11 = vsel %vm324_vm0, %v358_v7, 0.0  ;;  %v1290_v48 = vld [vmem:[%s1479_s4 + $0x28] sm:$0xff]  ;;  %v1302_v57 = vld [vmem:[%s1479_s4 + $0x38] sm:$0xff] }
  0xf2   : > { %370 = vadd.xlane.f32.xlu1 %v369_v55  ;;  %367 = vadd.xlane.f32.xlu0 %v366_v56 }
  0xf6   : > { %376 = vadd.xlane.f32.xlu1 %v375_v62  ;;  %373 = vadd.xlane.f32.xlu0 %v372_v63 }
  0xfa   : > { %382 = vadd.xlane.f32.xlu1 %v381_v10  ;;  %379 = vadd.xlane.f32.xlu0 %v378_v11 }
 0x177   : > { %v365_v23 = vpop.xlane.xlu1 %364  ;;  %v362_v24 = vpop.xlane.xlu0 %361 }
 0x178   : > { %v385_v25 = vadd.f32 %v365_v23, %v1260_v17  ;;  %v384_v26 = vadd.f32 %v362_v24, %v1265_v22 }
 0x17a   : > { %399 = vperm.xlu1 %849, %v385_v25   ;;  %394 = vperm.xlu0 %848, %v384_v26  }
 0x17b   : > { %v368_v31 = vpop.xlane.xlu0 %367  ;;  %v371_v37 = vpop.xlane.xlu1 %370 }
 0x17c   : > { %v386_v32 = vadd.f32 %v368_v31, %v1272_v28  ;;  %v387_v38 = vadd.f32 %v371_v37, %v1278_v35 }
 0x17e   : > { %404 = vperm.xlu1 %849, %v386_v32  }
 0x17f   : > { %v374_v46 = vpop.xlane.xlu0 %373  ;;  %v377_v49 = vpop.xlane.xlu1 %376 }
 0x180   : > { %v388_v47 = vadd.f32 %v374_v46, %v1284_v42  ;;  %v389_v50 = vadd.f32 %v377_v49, %v1290_v48 }
 0x182   : > { %409 = vperm.xlu1 %849, %v387_v38  }
 0x183   : > { %v380_v55 = vpop.xlane.xlu0 %379  ;;  %v383_v59 = vpop.xlane.xlu1 %382 }
 0x184   : > { %v390_v56 = vadd.f32 %v380_v55, %v1296_v51  ;;  %v391_v62 = vadd.f32 %v383_v59, %v1302_v57 }
 0x186   : > { %414 = vperm.xlu1 %849, %v388_v47  }
 0x18a   : > { %419 = vperm.xlu1 %849, %v389_v50  }
 0x18e   : > { %424 = vperm.xlu1 %849, %v390_v56  }
 0x192   : > { %429 = vperm.xlu1 %849, %v391_v62  }
 0x1f5   : > { %v400_v63 = vpop.permute.xlu1 %399  ;;  %v395_v7 = vpop.permute.xlu0 %394 }
 0x1f6   : > { %v433_v11 = vmul.f32 %v400_v63, %v1149_v30  ;;  %v432_v16 = vmul.f32 %v395_v7, %v1139_v27 }
 0x1f8   : > { %v441_v25 = vsel %vm324_vm0, %v433_v11, 0.0  ;;  %v440_v26 = vsel %vm324_vm0, %v432_v16, 0.0 }
 0x1f9   : > { %v405_v3 = vpop.permute.xlu1 %404  ;;  %v442_v38 = vadd.f32 %v441_v25, %v440_v26 }
 0x1fa   : > { %v434_v23 = vmul.f32 %v405_v3, %v1144_v29 }
 0x1fc   : > { %v443_v32 = vsel %vm324_vm0, %v434_v23, 0.0 }
 0x1fd   : > { %v410_v10 = vpop.permute.xlu1 %409  ;;  %v444_v50 = vadd.f32 %v443_v32, %v442_v38 }
 0x1fe   : > { %v435_v31 = vmul.f32 %v410_v10, %v1155_v34 }
 0x200   : > { %v445_v47 = vsel %vm324_vm0, %v435_v31, 0.0 }
 0x201   : > { %v415_v24 = vpop.permute.xlu1 %414  ;;  %v446_v56 = vadd.f32 %v445_v47, %v444_v50 }
 0x202   : > { %v436_v37 = vmul.f32 %v415_v24, %v1163_v40 }
 0x204   : > { %v447_v55 = vsel %vm324_vm0, %v436_v37, 0.0 }
 0x205   : > { %v420_v46 = vpop.permute.xlu1 %419  ;;  %v448_v3 = vadd.f32 %v447_v55, %v446_v56 }
 0x206   : > { %v437_v49 = vmul.f32 %v420_v46, %v1170_v45 }
 0x208   : > { %v449_v62 = vsel %vm324_vm0, %v437_v49, 0.0 }
 0x209   : > { %v425_v59 = vpop.permute.xlu1 %424  ;;  %v450_v10 = vadd.f32 %v449_v62, %v448_v3 }
 0x20a   : > { %v438_v63 = vmul.f32 %v425_v59, %v1179_v54 }
 0x20c   : > { %v451_v7 = vsel %vm324_vm0, %v438_v63, 0.0 }
 0x20d   : > { %v430_v11 = vpop.permute.xlu1 %429  ;;  %v452_v23 = vadd.f32 %v451_v7, %v450_v10 }
 0x20e   : > { %v439_v16 = vmul.f32 %v430_v11, %v1185_v58 }
 0x210   : > { %v453_v24 = vsel %vm324_vm0, %v439_v16, 0.0 }
 0x211   : > { %v454_v25 = vadd.f32 %v453_v24, %v452_v23 }
 0x213   : > { %v455_v26 = vrot.slane %v454_v25, 4 }
 0x215   : > { %v456_v31 = vadd.f32 %v455_v26, %v454_v25 }
 0x217   : > { %v457_v32 = vrot.slane %v456_v31, 2 }
 0x219   : > { %v458_v37 = vadd.f32 %v457_v32, %v456_v31 }
 0x21b   : > { %v459_v38 = vrot.slane %v458_v37, 1 }
 0x21d   : > { %v460_v46 = vadd.f32 %v459_v38, %v458_v37 }
 0x21f   : > { %v461_v47 = vadd.f32 %v460_v46, %v1195_v33 }
 0x221   : > { %v462_v49 = vmax.f32 %v461_v47, 0.0 }
 0x223   : > { %v466_v50 = vrot.slane %v462_v49, %v1197_v36 }
 0x225   : > { %v468_v55 = vmul.f32 %v466_v50, %v1203_v39  ;;  %v467_v56 = vmul.f32 %v466_v50, %v1208_v41  ;;  %v469_v63 = vmul.f32 %v466_v50, %v1219_v44  ;;  %v470_v3 = vmul.f32 %v466_v50, %v1214_v43 }
 0x226   : > { %v471_v11 = vmul.f32 %v466_v50, %v1235_v53  ;;  %v472_v16 = vmul.f32 %v466_v50, %v1230_v52  ;;  %v473_v25 = vmul.f32 %v466_v50, %v1249_v61  ;;  %v474_v26 = vmul.f32 %v466_v50, %v1244_v60 }
 0x227   : > { %v478_v59 = vsel %vm324_vm0, %v468_v55, 0.0  ;;  %v475_v62 = vsel %vm324_vm0, %v467_v56, 0.0  ;;  %v481_v7 = vsel %vm324_vm0, %v469_v63, 0.0  ;;  %v484_v10 = vsel %vm324_vm0, %v470_v3, 0.0 }
 0x228   : > { %479 = vadd.xlane.f32.xlu0 %v478_v59  ;;  %476 = vadd.xlane.f32.xlu1 %v475_v62  ;;  %v487_v23 = vsel %vm324_vm0, %v471_v11, 0.0  ;;  %v490_v24 = vsel %vm324_vm0, %v472_v16, 0.0  ;;  %v493_v31 = vsel %vm324_vm0, %v473_v25, 0.0  ;;  %v496_v32 = vsel %vm324_vm0, %v474_v26, 0.0 }
 0x22c   : > { %482 = vadd.xlane.f32.xlu0 %v481_v7  ;;  %485 = vadd.xlane.f32.xlu1 %v484_v10 }
 0x230   : > { %488 = vadd.xlane.f32.xlu0 %v487_v23  ;;  %491 = vadd.xlane.f32.xlu1 %v490_v24 }
 0x234   : > { %494 = vadd.xlane.f32.xlu0 %v493_v31  ;;  %497 = vadd.xlane.f32.xlu1 %v496_v32 }
 0x2b1   : > { %v480_v37 = vpop.xlane.xlu0 %479  ;;  %v477_v38 = vpop.xlane.xlu1 %476 }
 0x2b2   : > { %v500_v46 = vadd.f32 %v480_v37, %v1260_v17  ;;  %v499_v47 = vadd.f32 %v477_v38, %v1265_v22 }
 0x2b4   : > { %514 = vperm.xlu1 %849, %v500_v46   ;;  %509 = vperm.xlu0 %848, %v499_v47  }
 0x2b5   : > { %v483_v49 = vpop.xlane.xlu0 %482  ;;  %v486_v55 = vpop.xlane.xlu1 %485 }
 0x2b6   : > { %v501_v50 = vadd.f32 %v483_v49, %v1272_v28  ;;  %v502_v56 = vadd.f32 %v486_v55, %v1278_v35 }
 0x2b8   : > { %519 = vperm.xlu1 %849, %v501_v50   ;;  %524 = vperm.xlu0 %848, %v502_v56  }
 0x2b9   : > { %v489_v59 = vpop.xlane.xlu0 %488  ;;  %v492_v62 = vpop.xlane.xlu1 %491 }
 0x2ba   : > { %v503_v63 = vadd.f32 %v489_v59, %v1284_v42  ;;  %v504_v3 = vadd.f32 %v492_v62, %v1290_v48 }
 0x2bc   : > { %529 = vperm.xlu1 %849, %v503_v63   ;;  %534 = vperm.xlu0 %848, %v504_v3  }
 0x2bd   : > { %v495_v7 = vpop.xlane.xlu0 %494  ;;  %v498_v10 = vpop.xlane.xlu1 %497 }
 0x2be   : > { %v505_v11 = vadd.f32 %v495_v7, %v1296_v51  ;;  %v506_v16 = vadd.f32 %v498_v10, %v1302_v57 }
 0x2c0   : > { %539 = vperm.xlu1 %849, %v505_v11   ;;  %544 = vperm.xlu0 %848, %v506_v16  }
 0x32f   : > { %v510_v23 = vpop.permute.xlu0 %509  ;;  %v515_v24 = vpop.permute.xlu1 %514 }
 0x330   : > { %v547_v25 = vmul.f32 %v510_v23, %v1139_v27  ;;  %v548_v26 = vmul.f32 %v515_v24, %v1149_v30 }
 0x332   : > { %v555_v31 = vsel %vm324_vm0, %v547_v25, 0.0  ;;  %v556_v32 = vsel %vm324_vm0, %v548_v26, 0.0 }
 0x333   : > { %v525_v37 = vpop.permute.xlu0 %524  ;;  %v520_v38 = vpop.permute.xlu1 %519  ;;  %v557_v49 = vadd.f32 %v556_v32, %v555_v31 }
 0x334   : > { %v550_v46 = vmul.f32 %v525_v37, %v1155_v34  ;;  %v549_v47 = vmul.f32 %v520_v38, %v1144_v29 }
 0x336   : > { %v558_v55 = vsel %vm324_vm0, %v549_v47, 0.0  ;;  %v560_v27 = vsel %vm324_vm0, %v550_v46, 0.0 }
 0x337   : > { %v559_v50 = vadd.f32 %v558_v55, %v557_v49  ;;  %v535_v56 = vpop.permute.xlu0 %534  ;;  %v530_v59 = vpop.permute.xlu1 %529 }
 0x338   : > { %v552_v30 = vmul.f32 %v535_v56, %v1170_v45  ;;  %v551_v62 = vmul.f32 %v530_v59, %v1163_v40 }
 0x339   : > { %v561_v63 = vadd.f32 %v560_v27, %v559_v50 }
 0x33a   : > { %v562_v3 = vsel %vm324_vm0, %v551_v62, 0.0  ;;  %v564_v29 = vsel %vm324_vm0, %v552_v30, 0.0 }
 0x33b   : > { %v563_v7 = vadd.f32 %v562_v3, %v561_v63  ;;  %v545_v10 = vpop.permute.xlu0 %544  ;;  %v540_v34 = vpop.permute.xlu1 %539 }
 0x33c   : > { %v554_v11 = vmul.f32 %v545_v10, %v1185_v58  ;;  %v553_v16 = vmul.f32 %v540_v34, %v1179_v54 }
 0x33d   : > { %v565_v23 = vadd.f32 %v564_v29, %v563_v7 }
 0x33e   : > { %v566_v24 = vsel %vm324_vm0, %v553_v16, 0.0  ;;  %v568_v45 = vsel %vm324_vm0, %v554_v11, 0.0 }
 0x33f   : > { %v567_v25 = vadd.f32 %v566_v24, %v565_v23 }
 0x341   : > { %v569_v26 = vadd.f32 %v568_v45, %v567_v25 }
 0x343   : > { %v570_v40 = vrot.slane %v569_v26, 4 }
 0x345   : > { %v571_v31 = vadd.f32 %v570_v40, %v569_v26 }
 0x347   : > { %v572_v32 = vrot.slane %v571_v31, 2 }
 0x349   : > { %v573_v37 = vadd.f32 %v572_v32, %v571_v31 }
 0x34b   : > { %v574_v38 = vrot.slane %v573_v37, 1 }
 0x34d   : > { %v575_v46 = vadd.f32 %v574_v38, %v573_v37 }
 0x34f   : > { %v576_v47 = vadd.f32 %v575_v46, %v1195_v33 }
 0x351   : > { %v577_v49 = vmax.f32 %v576_v47, 0.0 }
 0x353   : > { %v581_v58 = vrot.slane %v577_v49, %v1197_v36 }
 0x355   : > { %v583_v54 = vmul.f32 %v581_v58, %v1203_v39  ;;  %v582_v55 = vmul.f32 %v581_v58, %v1208_v41  ;;  %v584_v59 = vmul.f32 %v581_v58, %v1219_v44  ;;  %v585_v27 = vmul.f32 %v581_v58, %v1214_v43 }
 0x356   : > { %v586_v36 = vmul.f32 %v581_v58, %v1235_v53  ;;  %v587_v39 = vmul.f32 %v581_v58, %v1230_v52  ;;  %v588_v44 = vmul.f32 %v581_v58, %v1249_v61  ;;  %v589_v43 = vmul.f32 %v581_v58, %v1244_v60 }
 0x357   : > { %v593_v50 = vsel %vm324_vm0, %v583_v54, 0.0  ;;  %v590_v56 = vsel %vm324_vm0, %v582_v55, 0.0  ;;  %v596_v30 = vsel %vm324_vm0, %v584_v59, 0.0  ;;  %v599_v33 = vsel %vm324_vm0, %v585_v27, 0.0 }
 0x358   : > { %594 = vadd.xlane.f32.xlu0 %v593_v50  ;;  %591 = vadd.xlane.f32.xlu1 %v590_v56  ;;  %v602_v41 = vsel %vm324_vm0, %v586_v36, 0.0  ;;  %v605_v62 = vsel %vm324_vm0, %v587_v39, 0.0  ;;  %v608_v63 = vsel %vm324_vm0, %v588_v44, 0.0  ;;  %v611_v3 = vsel %vm324_vm0, %v589_v43, 0.0 }
 0x35c   : > { %597 = vadd.xlane.f32.xlu0 %v596_v30  ;;  %600 = vadd.xlane.f32.xlu1 %v599_v33 }
 0x360   : > { %603 = vadd.xlane.f32.xlu0 %v602_v41  ;;  %606 = vadd.xlane.f32.xlu1 %v605_v62 }
 0x364   : > { %609 = vadd.xlane.f32.xlu0 %v608_v63  ;;  %612 = vadd.xlane.f32.xlu1 %v611_v3 }
 0x3e1   : > { %v595_v53 = vpop.xlane.xlu0 %594  ;;  %v592_v52 = vpop.xlane.xlu1 %591 }
 0x3e2   : > { %v615_v7 = vadd.f32 %v595_v53, %v1260_v17  ;;  %v614_v10 = vadd.f32 %v592_v52, %v1265_v22 }
 0x3e4   : > { %629 = vperm.xlu1 %849, %v615_v7   ;;  %624 = vperm.xlu0 %848, %v614_v10  }
 0x3e5   : > { %v598_v34 = vpop.xlane.xlu0 %597  ;;  %v601_v61 = vpop.xlane.xlu1 %600 }
 0x3e6   : > { %v616_v60 = vadd.f32 %v598_v34, %v1272_v28  ;;  %v617_v29 = vadd.f32 %v601_v61, %v1278_v35 }
 0x3e8   : > { %634 = vperm.xlu1 %849, %v616_v60   ;;  %639 = vperm.xlu0 %848, %v617_v29  }
 0x3e9   : > { %v604_v11 = vpop.xlane.xlu0 %603  ;;  %v607_v16 = vpop.xlane.xlu1 %606 }
 0x3ea   : > { %v618_v23 = vadd.f32 %v604_v11, %v1284_v42  ;;  %v619_v24 = vadd.f32 %v607_v16, %v1290_v48 }
 0x3ec   : > { %644 = vperm.xlu1 %849, %v618_v23   ;;  %649 = vperm.xlu0 %848, %v619_v24  }
 0x3ed   : > { %v610_v17 = vpop.xlane.xlu0 %609  ;;  %v613_v22 = vpop.xlane.xlu1 %612 }
 0x3ee   : > { %v620_v25 = vadd.f32 %v610_v17, %v1296_v51  ;;  %v621_v45 = vadd.f32 %v613_v22, %v1302_v57 }
 0x3f0   : > { %654 = vperm.xlu1 %849, %v620_v25   ;;  %659 = vperm.xlu0 %848, %v621_v45  }
 0x45f   : > { %v625_v28 = vpop.permute.xlu0 %624  ;;  %v630_v35 = vpop.permute.xlu1 %629 }
 0x460   : > { %v662_v26 = vmul.f32 %v625_v28, %v1088_v0  ;;  %v663_v40 = vmul.f32 %v625_v28, %v1090_v1  ;;  %v664_v42 = vmul.f32 %v630_v35, %v1098_v5  ;;  %v665_v48 = vmul.f32 %v630_v35, %v1100_v6 }
 0x462   : > { %678 = vst [vmem:[%s1395_s10] sm:$0xff] %v662_v26  ;;  %679 = vst [vmem:[%s1395_s10 + $0x8] sm:$0xff] %v663_v40 }
 0x463   : > { %680 = vst [vmem:[%s1395_s10 + $0x10] sm:$0xff] %v664_v42  ;;  %681 = vst [vmem:[%s1395_s10 + $0x18] sm:$0xff] %v665_v48  ;;  %v640_v0 = vpop.permute.xlu0 %639  ;;  %v635_v1 = vpop.permute.xlu1 %634 }
 0x464   : > { %v668_v5 = vmul.f32 %v640_v0, %v1104_v8  ;;  %v669_v6 = vmul.f32 %v640_v0, %v1106_v9  ;;  %v666_v51 = vmul.f32 %v635_v1, %v1092_v2  ;;  %v667_v57 = vmul.f32 %v635_v1, %v1096_v4 }
 0x466   : > { %684 = vst [vmem:[%s1395_s10 + $0x30] sm:$0xff] %v668_v5  ;;  %685 = vst [vmem:[%s1395_s10 + $0x38] sm:$0xff] %v669_v6 }
 0x467   : > { %682 = vst [vmem:[%s1395_s10 + $0x20] sm:$0xff] %v666_v51  ;;  %683 = vst [vmem:[%s1395_s10 + $0x28] sm:$0xff] %v667_v57  ;;  %v650_v31 = vpop.permute.xlu0 %649  ;;  %v645_v32 = vpop.permute.xlu1 %644 }
 0x468   : > { %v672_v37 = vmul.f32 %v650_v31, %v1116_v14  ;;  %v673_v8 = vmul.f32 %v650_v31, %v1118_v15  ;;  %v670_v38 = vmul.f32 %v645_v32, %v1112_v12  ;;  %v671_v9 = vmul.f32 %v645_v32, %v1114_v13 }
 0x46a   : > { %688 = vst [vmem:[%s1395_s10 + $0x50] sm:$0xff] %v672_v37  ;;  %689 = vst [vmem:[%s1395_s10 + $0x58] sm:$0xff] %v673_v8 }
 0x46b   : > { %686 = vst [vmem:[%s1395_s10 + $0x40] sm:$0xff] %v670_v38  ;;  %687 = vst [vmem:[%s1395_s10 + $0x48] sm:$0xff] %v671_v9  ;;  %v660_v2 = vpop.permute.xlu0 %659  ;;  %v655_v4 = vpop.permute.xlu1 %654 }
 0x46c   : > { %v676_v12 = vmul.f32 %v660_v2, %v1128_v20  ;;  %v677_v13 = vmul.f32 %v660_v2, %v1130_v21  ;;  %v674_v14 = vmul.f32 %v655_v4, %v1124_v18  ;;  %v675_v15 = vmul.f32 %v655_v4, %v1126_v19 }
 0x46e   : > { %692 = vst [vmem:[%s1395_s10 + $0x70] sm:$0xff] %v676_v12  ;;  %693 = vst [vmem:[%s1395_s10 + $0x78] sm:$0xff] %v677_v13 }
 0x46f   : > { %690 = vst [vmem:[%s1395_s10 + $0x60] sm:$0xff] %v674_v14  ;;  %691 = vst [vmem:[%s1395_s10 + $0x68] sm:$0xff] %v675_v15 }
 0x470   : > { %891 = shalt.err (!%p888_p10)
}
 0x471   : > { %s892_s15 = scalar_lea.hbm %s1422_s26, 2048  ;;  %s896_s7 = scalar_lea.hbm %s1480_s5, 4096 }
 0x472   : > { %p893_p0 = scmp.ne.s32.totalorder %s1422_s26, %s892_s15  ;;  %p897_p1 = scmp.lt.s32.totalorder %s1422_s26, %s1480_s5 }
 0x473   : > { %p898_p3 = scmp.lt.s32.totalorder %s896_s7, %s892_s15 }
 0x474   : > { %p894_p2 = pnand %p893_p0, %p1489_p12 }
 0x475   : > { %p899_p6 = por %p898_p3, %p897_p1 }
 0x476   : > { %p895_p9 = pneg %p894_p2 }
 0x478   : > { %p900_p11 = pnand %p899_p6, %p895_p9 }
 0x47a   : > { %903 = shalt.err (!%p900_p11)
}
 0x47b   : > { %s949_s25 = smov 256   ;;  %s950_s13 = smov 16  }
 0x47c   : > { %799 = dma.vmem_to_hbm [thread:$0]  (%p1489_p12), %s1424_s11, 2048, %s1422_s26, %s695_s22, %s949_s25, %s949_s25, %s950_s13  }
 0x47d PF: > { %s723_s17 = sand.u32 1, %s930_s18   ;;  %p1490_p13 = scmp.ne.s32.totalorder %s1486_s6, 0 }
 0x47e   : > { %p1491_p4 = scmp.ge.s32.totalorder %s942_s21, 2  ;;  %s724_s28 = scalar_lea.sflag [#allocation4], %s723_s17 }
 0x480   : > { %p806_p5 = pnand %p1491_p4, %p1490_p13 }
 0x482   : > { %p807_p7 = pneg %p806_p5 }
 0x484   : > { %925 = dma.done.wait (%p807_p7), %s724_s28, 2048  }
 0x485   : > { %927 = vsyncadd (%p807_p7), %s724_s28, 4294965248  ;;  %p18_p8 = scmp.ge.s32.totalorder %s1006_s24, 4   ;;  %s1492_s18 = smov %s934_s19 }
 0x486   : > { %s1493_s19 = smov %s938_s20  ;;  %s1494_s20 = smov %s1018_s27 }
 0x487   : > { %s1495_s21 = smov %s1006_s24  ;;  %20 = sbr.rel (!%p18_p8) target bundleno = 5 (0x5), region = 85 }
 0x48c   :  { %729 = vsyncpa [#allocation3], 1 }
 0x48d   :  { %731 = vsyncpa [#allocation3 + $0x1], 1 }
 0x48e   :  { %732 = vsyncpa [#allocation4], 1 }
 0x48f   :  { %734 = vsyncpa [#allocation4 + $0x1], 1 }

</bundles_post_ra>
